<compile_context>
chip_gen: v7x
topology: tpu7x:2x2x1
jax: 0.10.0
libtpu: 0.0.40
codegen_flags: <defaults>
</compile_context>

<pallas_src>
import numpy as np
import jax
import jax.numpy as jnp
from jax.experimental import pallas as pl
from jax.experimental.pallas import tpu as pltpu

MUL_SCALARS = 8
MUL_GATES = 8
GATED_L = 1                          # 8x1o
GATED_DIM_PER = 2 * GATED_L + 1      # 3 components per gated irrep
DIM_SCALARS = MUL_SCALARS            # 8
DIM_GATES = MUL_GATES                # 8
DIM_GATED = MUL_GATES * GATED_DIM_PER  # 24
DIM_IN = DIM_SCALARS + DIM_GATES + DIM_GATED   # 40
DIM_OUT = DIM_SCALARS + DIM_GATED              # 32


def _normalize2mom_const(f):
    # e3nn's Activation wraps each act with normalize2mom: f_hat(x) = c * f(x),
    # c = E_{z~N(0,1)}[f(z)^2]^{-1/2}.  e3nn estimates it by Monte Carlo; here we
    # use deterministic Gauss-Hermite quadrature (agrees to ~1e-3).
    # TODO(synk): bit-level parity with e3nn's MC estimate is not reproduced.
    xs, ws = np.polynomial.hermite.hermgauss(128)
    z = np.sqrt(2.0) * xs
    m2 = np.sum(ws * f(z) ** 2) / np.sqrt(np.pi)
    return float(m2 ** -0.5)


C_SILU = _normalize2mom_const(lambda x: x / (1.0 + np.exp(-x)))       # act_scalars
C_SIGMOID = _normalize2mom_const(lambda x: 1.0 / (1.0 + np.exp(-x)))  # act_gates


def _gate_kernel(x_ref, o_ref):
    # Feature-major tile: x_ref is (DIM_IN, tile), o_ref is (DIM_OUT, tile).
    # The e3nn feature layout [scalars | gates | gated] is now sublane bands
    # (8 / 8 / 24 rows, 8-aligned for f32), and the lane dim is a full
    # multiple of 128, so every vector op below runs on dense vregs.
    x = x_ref[...]
    t = x.shape[-1]

    s = x[:DIM_SCALARS, :].astype(jnp.float32)
    g = x[DIM_SCALARS:DIM_SCALARS + DIM_GATES, :].astype(jnp.float32)

    # act_scalars: normalized SiLU (EUP sigmoid + VPU mul).
    act_s = C_SILU * s * jax.nn.sigmoid(s)
    # act_gates: normalized sigmoid.
    gates = C_SIGMOID * jax.nn.sigmoid(g)            # (8, tile), f32

    # Scalar band: sublane-aligned, full-lane-width store.
    o_ref[:DIM_SCALARS, :] = act_s.astype(o_ref.dtype)

    # Gate expansion: each gate row is sublane-broadcast over its 2l+1 = 3
    # gated components (no MXU matmul, no bf16 precision hazard).  The gated
    # features stay in the input dtype for the multiply (bf16 VALU on
    # v6e/v7x); on v5e feed f32 inputs.  The in-kernel band stores are VMEM
    # writes only -- the HBM writeback is the full lane-dense (32, tile) block.
    # TODO(synk): packing the 8 bands into one (24, tile) value would need a
    # sublane-collapsing reshape; kept as per-band stores for robust lowering.
    for i in range(MUL_GATES):
        in_lo = DIM_SCALARS + DIM_GATES + i * GATED_DIM_PER
        out_lo = DIM_SCALARS + i * GATED_DIM_PER
        v_i = x[in_lo:in_lo + GATED_DIM_PER, :]                    # (3, tile)
        g_i = jnp.broadcast_to(gates[i:i + 1, :], (GATED_DIM_PER, t))
        o_ref[out_lo:out_lo + GATED_DIM_PER, :] = (
            v_i * g_i.astype(v_i.dtype)).astype(o_ref.dtype)


def _round_up(x, m):
    return (x + m - 1) // m * m


def gate_forward_fm(x_fm, *, tile_lanes=32768):
    """Gate on feature-major node_hiddens: x_fm is (DIM_IN, N) -> (DIM_OUT, N)."""
    d, n = x_fm.shape
    assert d == DIM_IN, f"expected feature dim {DIM_IN}, got {d}"

    if n <= 128:
        # Tiny inputs: a single block equal to the full array (block dims equal
        # to the array dims are always legal).
        tile = n
    else:
        # Lane tile: multiple of 128, large enough to amortize the ~0.35 us
        # per-grid-step overhead.  Double-buffered VMEM = 2*(40+32)*tile*itemsize;
        # at tile=32768 / f32 that is ~19 MiB, well under the 32 MiB scoped
        # limit below (v7x has 64 MiB physical).
        tile = min(_round_up(tile_lanes, 128), _round_up(n, 128))
        # Keep >= 2 grid steps when there is enough work so the "parallel"
        # node axis can shard across v7x's two TensorCores.
        if pl.cdiv(n, tile) < 2:
            tile = max(128, _round_up(pl.cdiv(n, 2), 128))

    grid = (pl.cdiv(n, tile),)   # ragged tail handled by Pallas masking
    return pl.pallas_call(
        _gate_kernel,
        out_shape=jax.ShapeDtypeStruct((DIM_OUT, n), x_fm.dtype),
        grid=grid,
        in_specs=[pl.BlockSpec((DIM_IN, tile), lambda i: (0, i))],
        out_specs=pl.BlockSpec((DIM_OUT, tile), lambda i: (0, i)),
        compiler_params=pltpu.CompilerParams(
            dimension_semantics=("parallel",),
            vmem_limit_bytes=32 * 1024 * 1024),
    )(x_fm)


def gate_forward(node_hiddens, *, tile_lanes=32768):
    """PyTorch-layout entry point: node_hiddens (N, DIM_IN) -> (N, DIM_OUT).

    TODO(synk): the two transposes below are pure layout plumbing (one extra
    HBM pass each); the producer should emit node_hiddens feature-major (or
    fuse this gate into its epilogue) and call gate_forward_fm directly.
    """
    n, d = node_hiddens.shape
    assert d == DIM_IN, f"expected feature dim {DIM_IN}, got {d}"
    return gate_forward_fm(node_hiddens.T, tile_lanes=tile_lanes).T


def equivariant_gate(data):
    # PyTorch module mutates data['node_hiddens'] in place and returns None;
    # here we return an updated dict (functional JAX style).
    data = dict(data)
    data['node_hiddens'] = gate_forward(data['node_hiddens'])
    return data


def _reference_gate(x):
    s = x[:, :DIM_SCALARS]
    g = x[:, DIM_SCALARS:DIM_SCALARS + DIM_GATES]
    v = x[:, DIM_SCALARS + DIM_GATES:]
    gates = C_SIGMOID * jax.nn.sigmoid(g)
    gated = (v.reshape(-1, MUL_GATES, GATED_DIM_PER)
             * gates[:, :, None]).reshape(-1, DIM_GATED)
    return jnp.concatenate([C_SILU * jax.nn.silu(s), gated], axis=-1)


if __name__ == "__main__":
    key = jax.random.PRNGKey(0)
    k0, k1 = jax.random.split(key)

    # Small case (single full-array block).
    num_nodes = 16
    x = jax.random.normal(k0, (num_nodes, DIM_IN), dtype=jnp.float32)
    data = {'node_hiddens': x}
    out = equivariant_gate(data)
    y = jax.block_until_ready(out['node_hiddens'])
    assert y.shape == (num_nodes, DIM_OUT)
    assert jnp.allclose(y, _reference_gate(x), atol=1e-5), "mismatch vs reference"

    # Ragged case (exercises the multi-step grid with a masked last block).
    x2 = jax.random.normal(k1, (300, DIM_IN), dtype=jnp.float32)
    y2 = jax.block_until_ready(gate_forward(x2))
    assert y2.shape == (300, DIM_OUT)
    assert jnp.allclose(y2, _reference_gate(x2), atol=1e-5), "mismatch vs reference (ragged)"

    print("KERNEL_OK")
</pallas_src>

<mosaic_0001>
module attributes {stable_mosaic.version = 11 : i64} {
  func.func @_gate_kernel(%arg0: i32, %arg1: memref<40x16xf32, #tpu.memory_space<vmem>>, %arg2: memref<32x16xf32, #tpu.memory_space<vmem>>) attributes {dimension_semantics = [#tpu.dimension_semantics<parallel>], iteration_bounds = array<i64: 1>, scalar_prefetch = 0 : i64, scratch_operands = 0 : i64, tpu.core_type = #tpu.core_type<tc>, window_params = [{transform_indices = @transform_0, window_bounds = array<i64: 40, 16>}, {transform_indices = @transform_1, window_bounds = array<i64: 32, 16>}]} {
    %c0 = arith.constant 0 : index
    %c0_0 = arith.constant 0 : index
    %0 = vector.load %arg1[%c0, %c0_0] : memref<40x16xf32, #tpu.memory_space<vmem>>, vector<40x16xf32>
    %1 = vector.extract_strided_slice %0 {offsets = [0, 0], sizes = [8, 16], strides = [1, 1]} : vector<40x16xf32> to vector<8x16xf32>
    %2 = vector.extract_strided_slice %0 {offsets = [8, 0], sizes = [8, 16], strides = [1, 1]} : vector<40x16xf32> to vector<8x16xf32>
    %cst = arith.constant 1.67653251 : f32
    %3 = vector.broadcast %cst : f32 to vector<8x16xf32>
    %4 = arith.mulf %3, %1 : vector<8x16xf32>
    %5 = arith.negf %1 : vector<8x16xf32>
    %6 = math.exp %5 : vector<8x16xf32>
    %cst_1 = arith.constant 1.000000e+00 : f32
    %7 = vector.broadcast %cst_1 : f32 to vector<8x16xf32>
    %8 = arith.addf %7, %6 : vector<8x16xf32>
    %9 = arith.divf %7, %8 : vector<8x16xf32>
    %10 = arith.mulf %4, %9 : vector<8x16xf32>
    %11 = arith.negf %2 : vector<8x16xf32>
    %12 = math.exp %11 : vector<8x16xf32>
    %cst_2 = arith.constant 1.000000e+00 : f32
    %13 = vector.broadcast %cst_2 : f32 to vector<8x16xf32>
    %14 = arith.addf %13, %12 : vector<8x16xf32>
    %15 = arith.divf %13, %14 : vector<8x16xf32>
    %cst_3 = arith.constant 1.8462286 : f32
    %16 = vector.broadcast %cst_3 : f32 to vector<8x16xf32>
    %17 = arith.mulf %16, %15 : vector<8x16xf32>
    %c0_4 = arith.constant 0 : index
    %c0_5 = arith.constant 0 : index
    %18 = vector.load %arg2[%c0_4, %c0_5] : memref<32x16xf32, #tpu.memory_space<vmem>>, vector<8x16xf32>
    tpu.vector_store %arg2[%c0_4, %c0_5], %10 {strides = array<i32>} : memref<32x16xf32, #tpu.memory_space<vmem>>, vector<8x16xf32>,
    %19 = vector.extract_strided_slice %0 {offsets = [16, 0], sizes = [3, 16], strides = [1, 1]} : vector<40x16xf32> to vector<3x16xf32>
    %20 = vector.extract_strided_slice %17 {offsets = [0, 0], sizes = [1, 16], strides = [1, 1]} : vector<8x16xf32> to vector<1x16xf32>
    %21 = vector.shape_cast %20 : vector<1x16xf32> to vector<1x16xf32>
    %22 = vector.broadcast %21 : vector<1x16xf32> to vector<3x16xf32>
    %23 = arith.mulf %19, %22 : vector<3x16xf32>
    %c8 = arith.constant 8 : index
    %c0_6 = arith.constant 0 : index
    %24 = vector.load %arg2[%c8, %c0_6] : memref<32x16xf32, #tpu.memory_space<vmem>>, vector<3x16xf32>
    tpu.vector_store %arg2[%c8, %c0_6], %23 {strides = array<i32>} : memref<32x16xf32, #tpu.memory_space<vmem>>, vector<3x16xf32>,
    %25 = vector.extract_strided_slice %0 {offsets = [19, 0], sizes = [3, 16], strides = [1, 1]} : vector<40x16xf32> to vector<3x16xf32>
    %26 = vector.extract_strided_slice %17 {offsets = [1, 0], sizes = [1, 16], strides = [1, 1]} : vector<8x16xf32> to vector<1x16xf32>
    %27 = vector.shape_cast %26 : vector<1x16xf32> to vector<1x16xf32>
    %28 = vector.broadcast %27 : vector<1x16xf32> to vector<3x16xf32>
    %29 = arith.mulf %25, %28 : vector<3x16xf32>
    %c11 = arith.constant 11 : index
    %c0_7 = arith.constant 0 : index
    %30 = vector.load %arg2[%c11, %c0_7] : memref<32x16xf32, #tpu.memory_space<vmem>>, vector<3x16xf32>
    tpu.vector_store %arg2[%c11, %c0_7], %29 {strides = array<i32>} : memref<32x16xf32, #tpu.memory_space<vmem>>, vector<3x16xf32>,
    %31 = vector.extract_strided_slice %0 {offsets = [22, 0], sizes = [3, 16], strides = [1, 1]} : vector<40x16xf32> to vector<3x16xf32>
    %32 = vector.extract_strided_slice %17 {offsets = [2, 0], sizes = [1, 16], strides = [1, 1]} : vector<8x16xf32> to vector<1x16xf32>
    %33 = vector.shape_cast %32 : vector<1x16xf32> to vector<1x16xf32>
    %34 = vector.broadcast %33 : vector<1x16xf32> to vector<3x16xf32>
    %35 = arith.mulf %31, %34 : vector<3x16xf32>
    %c14 = arith.constant 14 : index
    %c0_8 = arith.constant 0 : index
    %36 = vector.load %arg2[%c14, %c0_8] : memref<32x16xf32, #tpu.memory_space<vmem>>, vector<3x16xf32>
    tpu.vector_store %arg2[%c14, %c0_8], %35 {strides = array<i32>} : memref<32x16xf32, #tpu.memory_space<vmem>>, vector<3x16xf32>,
    %37 = vector.extract_strided_slice %0 {offsets = [25, 0], sizes = [3, 16], strides = [1, 1]} : vector<40x16xf32> to vector<3x16xf32>
    %38 = vector.extract_strided_slice %17 {offsets = [3, 0], sizes = [1, 16], strides = [1, 1]} : vector<8x16xf32> to vector<1x16xf32>
    %39 = vector.shape_cast %38 : vector<1x16xf32> to vector<1x16xf32>
    %40 = vector.broadcast %39 : vector<1x16xf32> to vector<3x16xf32>
    %41 = arith.mulf %37, %40 : vector<3x16xf32>
    %c17 = arith.constant 17 : index
    %c0_9 = arith.constant 0 : index
    %42 = vector.load %arg2[%c17, %c0_9] : memref<32x16xf32, #tpu.memory_space<vmem>>, vector<3x16xf32>
    tpu.vector_store %arg2[%c17, %c0_9], %41 {strides = array<i32>} : memref<32x16xf32, #tpu.memory_space<vmem>>, vector<3x16xf32>,
    %43 = vector.extract_strided_slice %0 {offsets = [28, 0], sizes = [3, 16], strides = [1, 1]} : vector<40x16xf32> to vector<3x16xf32>
    %44 = vector.extract_strided_slice %17 {offsets = [4, 0], sizes = [1, 16], strides = [1, 1]} : vector<8x16xf32> to vector<1x16xf32>
    %45 = vector.shape_cast %44 : vector<1x16xf32> to vector<1x16xf32>
    %46 = vector.broadcast %45 : vector<1x16xf32> to vector<3x16xf32>
    %47 = arith.mulf %43, %46 : vector<3x16xf32>
    %c20 = arith.constant 20 : index
    %c0_10 = arith.constant 0 : index
    %48 = vector.load %arg2[%c20, %c0_10] : memref<32x16xf32, #tpu.memory_space<vmem>>, vector<3x16xf32>
    tpu.vector_store %arg2[%c20, %c0_10], %47 {strides = array<i32>} : memref<32x16xf32, #tpu.memory_space<vmem>>, vector<3x16xf32>,
    %49 = vector.extract_strided_slice %0 {offsets = [31, 0], sizes = [3, 16], strides = [1, 1]} : vector<40x16xf32> to vector<3x16xf32>
    %50 = vector.extract_strided_slice %17 {offsets = [5, 0], sizes = [1, 16], strides = [1, 1]} : vector<8x16xf32> to vector<1x16xf32>
    %51 = vector.shape_cast %50 : vector<1x16xf32> to vector<1x16xf32>
    %52 = vector.broadcast %51 : vector<1x16xf32> to vector<3x16xf32>
    %53 = arith.mulf %49, %52 : vector<3x16xf32>
    %c23 = arith.constant 23 : index
    %c0_11 = arith.constant 0 : index
    %54 = vector.load %arg2[%c23, %c0_11] : memref<32x16xf32, #tpu.memory_space<vmem>>, vector<3x16xf32>
    tpu.vector_store %arg2[%c23, %c0_11], %53 {strides = array<i32>} : memref<32x16xf32, #tpu.memory_space<vmem>>, vector<3x16xf32>,
    %55 = vector.extract_strided_slice %0 {offsets = [34, 0], sizes = [3, 16], strides = [1, 1]} : vector<40x16xf32> to vector<3x16xf32>
    %56 = vector.extract_strided_slice %17 {offsets = [6, 0], sizes = [1, 16], strides = [1, 1]} : vector<8x16xf32> to vector<1x16xf32>
    %57 = vector.shape_cast %56 : vector<1x16xf32> to vector<1x16xf32>
    %58 = vector.broadcast %57 : vector<1x16xf32> to vector<3x16xf32>
    %59 = arith.mulf %55, %58 : vector<3x16xf32>
    %c26 = arith.constant 26 : index
    %c0_12 = arith.constant 0 : index
    %60 = vector.load %arg2[%c26, %c0_12] : memref<32x16xf32, #tpu.memory_space<vmem>>, vector<3x16xf32>
    tpu.vector_store %arg2[%c26, %c0_12], %59 {strides = array<i32>} : memref<32x16xf32, #tpu.memory_space<vmem>>, vector<3x16xf32>,
    %61 = vector.extract_strided_slice %0 {offsets = [37, 0], sizes = [3, 16], strides = [1, 1]} : vector<40x16xf32> to vector<3x16xf32>
    %62 = vector.extract_strided_slice %17 {offsets = [7, 0], sizes = [1, 16], strides = [1, 1]} : vector<8x16xf32> to vector<1x16xf32>
    %63 = vector.shape_cast %62 : vector<1x16xf32> to vector<1x16xf32>
    %64 = vector.broadcast %63 : vector<1x16xf32> to vector<3x16xf32>
    %65 = arith.mulf %61, %64 : vector<3x16xf32>
    %c29 = arith.constant 29 : index
    %c0_13 = arith.constant 0 : index
    %66 = vector.load %arg2[%c29, %c0_13] : memref<32x16xf32, #tpu.memory_space<vmem>>, vector<3x16xf32>
    tpu.vector_store %arg2[%c29, %c0_13], %65 {strides = array<i32>} : memref<32x16xf32, #tpu.memory_space<vmem>>, vector<3x16xf32>,
    return
  }
  func.func @transform_0(%arg0: i32) -> (i32, i32) {
    %c0_i32 = arith.constant 0 : i32
    %c0_i32_0 = arith.constant 0 : i32
    return %c0_i32, %arg0 : i32, i32
  }
  func.func @transform_1(%arg0: i32) -> (i32, i32) {
    %c0_i32 = arith.constant 0 : i32
    %c0_i32_0 = arith.constant 0 : i32
    return %c0_i32, %arg0 : i32, i32
  }
}

</mosaic_0001>

<bundles_post_ra>
// kernel: tpu_custom_call.1
= control target key start
LH: loop header
LB: loop body
LE: loop exit
PB: predicated region body
PF: predicated region fallthrough
CT: control target
= control target key end

     0   :  { %v30_v8 = vlaneseq  ;;  %vm28_vm0 = vcmask 130048   ;;  %vm35_vm1 = vcmask 124928   ;;  %vm42_vm2 = vcmask 128003   ;;  %s175_s0 = inlined_call_operand.vmem [shape: f32[40,16], index: 0, kind: input, shape index: {}]   ;;  %s176_s1 = inlined_call_operand.vmem [shape: f32[32,16], index: 1, kind: output, shape index: {}]  }
   0x1   :  { %v8_v0 = vld [vmem:[%s175_s0] sm:$0xff]  ;;  %v9_v1 = vld [vmem:[%s175_s0 + $0x8] sm:$0xff]  ;;  %vm50_vm3 = vcmask 130054   ;;  %vm52_vm4 = vcmask 122880   ;;  %vm59_vm5 = vcmask 125953   ;;  %vm66_vm6 = vcmask 129028  }
   0x2   :  { %v96_v2 = vmul.f32 -1.442695, %v8_v0  ;;  %v97_v3 = vmul.f32 -1.442695, %v9_v1  ;;  %v31_v9 = vshrl.u32 %v30_v8, 7  ;;  %v10_v23 = vld [vmem:[%s175_s0 + $0x10] sm:$0xff] }
   0x3   :  { %v13_v10 = vmul.f32 1.6765325, %v8_v0  ;;  %v11_v24 = vld [vmem:[%s175_s0 + $0x18] sm:$0xff]  ;;  %vm74_vm7 = vcmask 130055   ;;  %vm76_vm8 = vcmask 123904   ;;  %vm83_vm9 = vcmask 126978  }
   0x4   :  { %98 = vpow2.f32 %v96_v2  ;;  %v32_v11 = vsub.s32 0, %v31_v9  ;;  %v39_v13 = vsub.s32 1, %v31_v9  ;;  %v46_v14 = vsub.s32 2, %v31_v9  ;;  %v12_v29 = vld [vmem:[%s175_s0 + $0x20] sm:$0xff] }
   0x5   :  { %100 = vpow2.f32 %v97_v3  ;;  %v56_v15 = vsub.s32 3, %v31_v9  ;;  %v63_v16 = vsub.s32 4, %v31_v9  ;;  %v70_v19 = vsub.s32 5, %v31_v9 }
   0x6   :  { %v80_v20 = vsub.s32 6, %v31_v9  ;;  %v87_v21 = vsub.s32 7, %v31_v9  ;;  %vm90_vm10 = vcmask 130053  }
   0xe   :  { %v99_v4 = vpop.eup %98 }
   0xf   :  { %v101_v5 = vpop.eup %100  ;;  %v17_v6 = vadd.f32 1.0, %v99_v4 }
  0x10   :  { %v24_v7 = vadd.f32 1.0, %v101_v5 }
  0x11   :  { %102 = vrcp.f32 %v17_v6 }
  0x12   :  { %104 = vrcp.f32 %v24_v7 }
  0x1b   :  { %v103_v12 = vpop.eup %102 }
  0x1c   :  { %v105_v17 = vpop.eup %104  ;;  %v20_v18 = vmul.f32 %v103_v12, %v13_v10 }
  0x1d   :  { %v27_v22 = vmul.f32 1.8462286, %v105_v17 }
  0x1e   :  { %29 = vst.msk [vmem:[%s176_s1] sm:$0xff] %vm28_vm0, %v20_v18 }
  0x1f   :  { %v33_v25 = vrot.slane %v27_v22, %v32_v11  ;;  %v40_v26 = vrot.slane %v27_v22, %v39_v13  ;;  %v47_v27 = vrot.slane %v27_v22, %v46_v14  ;;  %v57_v28 = vrot.slane %v27_v22, %v56_v15 }
  0x20   :  { %v64_v30 = vrot.slane %v27_v22, %v63_v16  ;;  %v71_v31 = vrot.slane %v27_v22, %v70_v19  ;;  %v81_v32 = vrot.slane %v27_v22, %v80_v20  ;;  %v88_v33 = vrot.slane %v27_v22, %v87_v21 }
  0x21   :  { %v34_v34 = vmul.f32 %v33_v25, %v10_v23  ;;  %v41_v35 = vmul.f32 %v40_v26, %v10_v23  ;;  %v48_v36 = vmul.f32 %v47_v27, %v10_v23  ;;  %v49_v37 = vmul.f32 %v47_v27, %v11_v24 }
  0x22   :  { %v58_v38 = vmul.f32 %v57_v28, %v11_v24  ;;  %v65_v39 = vmul.f32 %v64_v30, %v11_v24  ;;  %v72_v40 = vmul.f32 %v71_v31, %v11_v24  ;;  %v73_v41 = vmul.f32 %v71_v31, %v12_v29 }
  0x23   :  { %36 = vst.msk [vmem:[%s176_s1 + $0x8] sm:$0x7] %vm35_vm1, %v34_v34  ;;  %v82_v42 = vmul.f32 %v81_v32, %v12_v29  ;;  %v89_v43 = vmul.f32 %v88_v33, %v12_v29 }
  0x24   :  { %43 = vst.msk [vmem:[%s176_s1 + $0x8] sm:$0x38] %vm42_vm2, %v41_v35 }
  0x25   :  { %51 = vst.msk [vmem:[%s176_s1 + $0x8] sm:$0xc0] %vm50_vm3, %v48_v36 }
  0x26   :  { %53 = vst.msk [vmem:[%s176_s1 + $0x10] sm:$0x1] %vm52_vm4, %v49_v37 }
  0x27   :  { %60 = vst.msk [vmem:[%s176_s1 + $0x10] sm:$0xe] %vm59_vm5, %v58_v38 }
  0x28   :  { %67 = vst.msk [vmem:[%s176_s1 + $0x10] sm:$0x70] %vm66_vm6, %v65_v39 }
  0x29   :  { %75 = vst.msk [vmem:[%s176_s1 + $0x10] sm:$0x80] %vm74_vm7, %v72_v40 }
  0x2a   :  { %77 = vst.msk [vmem:[%s176_s1 + $0x18] sm:$0x3] %vm76_vm8, %v73_v41 }
  0x2b   :  { %84 = vst.msk [vmem:[%s176_s1 + $0x18] sm:$0x1c] %vm83_vm9, %v82_v42 }
  0x2c   :  { %91 = vst.msk [vmem:[%s176_s1 + $0x18] sm:$0xe0] %vm90_vm10, %v89_v43 }

</bundles_post_ra>
